<compile_context>
chip_gen: v7x
topology: tpu7x:2x2x1
jax: 0.10.0
libtpu: 0.0.40
codegen_flags: <defaults>
</compile_context>

<pallas_src>
import jax
import jax.numpy as jnp
from jax.experimental import pallas as pl
from jax.experimental.pallas import tpu as pltpu


_LANE = 128


def _round_up(x, m):
    return ((x + m - 1) // m) * m


def _cdiv(a, b):
    return (a + b - 1) // b


def _vmem_capacity_bytes():
    """Physical VMEM per TensorCore (generation-aware, with safe fallback)."""
    try:
        info = pltpu.get_tpu_info()
        cap = int(getattr(info, "vmem_capacity_bytes", 0))
        if cap > 0:
            return cap
    except Exception:
        pass
    # Conservative fallback: v7x has the smallest VMEM (64 MiB / TC).
    return 64 * 1024 * 1024


def _make_single_k_kernel(compute_dtype):
    # Single K block: no accumulator scratch, no zero-init / finalize passes.
    def kernel(x_ref, w_ref, b_ref, o_ref):
        x = x_ref[...].astype(compute_dtype)        # in-kernel cast (no extra HBM pass)
        acc = jnp.dot(x, w_ref[...], preferred_element_type=jnp.float32)
        o_ref[...] = (acc + b_ref[...]).astype(o_ref.dtype)

    return kernel


def _make_multi_k_kernel(compute_dtype):
    # K split across the last ("arbitrary") grid axis: f32 VMEM accumulator.
    def kernel(x_ref, w_ref, b_ref, o_ref, acc_ref):
        k = pl.program_id(2)

        @pl.when(k == 0)
        def _init():
            acc_ref[...] = jnp.zeros_like(acc_ref)

        x = x_ref[...].astype(compute_dtype)
        acc_ref[...] += jnp.dot(x, w_ref[...], preferred_element_type=jnp.float32)

        @pl.when(k == pl.num_programs(2) - 1)
        def _finalize():
            o_ref[...] = (acc_ref[...] + b_ref[...]).astype(o_ref.dtype)

    return kernel


def bbox_regression_forward(
    x,
    weight_t,
    bias,
    num_classes,
    *,
    compute_dtype=None,   # e.g. jnp.bfloat16 (cast happens inside the kernel)
    out_dtype=None,
    tm=None,              # batch (row) tile override
    tn=None,              # output-column tile override (multiple of 128)
    tk=None,              # K tile override (multiple of 128)
):
    """x: (B, feature_dim); weight_t: (feature_dim, num_classes*4);
    bias: (num_classes*4,) or (1, num_classes*4). Returns (B, num_classes, 4)."""
    B, K = x.shape
    N = weight_t.shape[1]
    assert N == num_classes * 4, "weight_t last dim must be num_classes*4"

    if compute_dtype is None:
        compute_dtype = x.dtype
    if out_dtype is None:
        out_dtype = x.dtype

    x_isz = jnp.dtype(x.dtype).itemsize            # x is DMA'd in its native dtype
    w_isz = jnp.dtype(compute_dtype).itemsize
    o_isz = jnp.dtype(out_dtype).itemsize
    row_mult = 16 if min(x_isz, o_isz) == 2 else 8  # sublane packing granularity

    vmem_cap = _vmem_capacity_bytes()
    budget = int(0.80 * vmem_cap)                   # tile-selection budget

    # --- M tile: balanced (minimal B padding); >=2 blocks when B is large so
    #     the 'parallel' M axis can shard across two TensorCores (v7x). -------
    if tm is None:
        nbm = max(1, _cdiv(B, 512))
        if nbm == 1 and B >= 2 * _LANE:
            nbm = 2
        tm = min(512, _cdiv(B, nbm))
    tm = min(_round_up(tm, row_mult), _round_up(B, row_mult))

    # --- N tile: lane-dense (multiple of 128); split only for very wide heads.
    Np0 = _round_up(N, _LANE)
    if tn is None:
        nbn = max(1, _cdiv(Np0, 512))
        tn = _cdiv(Np0, nbn)
    tn = min(_round_up(tn, _LANE), Np0)
    Np = _round_up(Np0, tn)

    # --- K tile: multiple of 128; full K if it fits the VMEM budget, else
    #     halve until it does (accumulator cost included once K is split). ----
    Kp0 = _round_up(K, _LANE)
    if tk is None:
        tk = Kp0
    tk = min(_round_up(tk, _LANE), Kp0)

    def vmem_est(tk_):
        est = (2 * (tm * tk_ * x_isz + tk_ * tn * w_isz + tn * 4)   # dbl-buffered inputs
               + 2 * tm * tn * o_isz)                               # dbl-buffered output
        if _cdiv(Kp0, tk_) > 1:
            est += tm * tn * 4                                      # f32 accumulator
        return est

    while tk > _LANE and vmem_est(tk) > budget:
        tk = _round_up(tk // 2, _LANE)

    Bp = _round_up(B, tm)
    Kp = _round_up(K, tk)

    m_blocks = Bp // tm
    n_blocks = Np // tn
    k_blocks = Kp // tk

    # --- Prepare operands (x stays native dtype; pad only when needed) -------
    xd = x
    wd = weight_t if weight_t.dtype == compute_dtype else weight_t.astype(compute_dtype)
    bd = jnp.reshape(bias, (1, -1)).astype(jnp.float32)

    if (Bp, Kp) != (B, K):
        xd = jnp.pad(xd, ((0, Bp - B), (0, Kp - K)))
    if (Kp, Np) != (K, N):
        wd = jnp.pad(wd, ((0, Kp - K), (0, Np - N)))
    if Np != N:
        bd = jnp.pad(bd, ((0, 0), (0, Np - N)))

    # --- Kernel selection + VMEM limit ---------------------------------------
    if k_blocks == 1:
        kernel = _make_single_k_kernel(compute_dtype)
        scratch = []
    else:
        kernel = _make_multi_k_kernel(compute_dtype)
        scratch = [pltpu.VMEM((tm, tn), jnp.float32)]

    est = vmem_est(tk)
    vmem_limit = int(min(max(est * 3 // 2, 32 * 1024 * 1024), int(0.85 * vmem_cap)))

    out = pl.pallas_call(
        kernel,
        out_shape=jax.ShapeDtypeStruct((Bp, Np), out_dtype),
        grid_spec=pltpu.PrefetchScalarGridSpec(
            num_scalar_prefetch=0,
            grid=(m_blocks, n_blocks, k_blocks),
            in_specs=[
                pl.BlockSpec((tm, tk), lambda i, j, k: (i, k)),   # x tile
                pl.BlockSpec((tk, tn), lambda i, j, k: (k, j)),   # weight slab
                pl.BlockSpec((1, tn), lambda i, j, k: (0, j)),    # bias row (f32)
            ],
            out_specs=pl.BlockSpec((tm, tn), lambda i, j, k: (i, j)),
            scratch_shapes=scratch,
        ),
        compiler_params=pltpu.CompilerParams(
            dimension_semantics=("parallel", "parallel", "arbitrary"),
            vmem_limit_bytes=vmem_limit,
        ),
    )(xd, wd, bd)

    # Strip padding, then out.view(out.size(0), -1, 4)
    out = out[:B, :N]
    return out.reshape(B, num_classes, 4)


if __name__ == "__main__":
    key = jax.random.PRNGKey(0)

    # ---- Test 1: f32 path, aligned shapes, single-K single-N fast path -----
    batch, feature_dim, num_classes = 8, 128, 32
    out_dim = num_classes * 4
    k1, k2, k3, key = jax.random.split(key, 4)
    x = jax.random.normal(k1, (batch, feature_dim), dtype=jnp.float32)
    bound = 1.0 / (feature_dim ** 0.5)
    weight_t = jax.random.uniform(
        k2, (feature_dim, out_dim), jnp.float32, minval=-bound, maxval=bound
    )
    bias = jax.random.uniform(
        k3, (1, out_dim), jnp.float32, minval=-bound, maxval=bound
    )

    y = bbox_regression_forward(x, weight_t, bias, num_classes)
    y = jax.block_until_ready(y)
    ref = (x @ weight_t + bias).reshape(batch, num_classes, 4)
    assert y.shape == (batch, num_classes, 4)
    assert jnp.allclose(y, ref, atol=1e-5, rtol=1e-5)

    # ---- Test 2: bf16 compute (in-kernel cast), unaligned B / K / N --------
    batch2, feature_dim2, num_classes2 = 10, 96, 5
    out_dim2 = num_classes2 * 4
    k1, k2, k3, key = jax.random.split(key, 4)
    x2 = jax.random.normal(k1, (batch2, feature_dim2), dtype=jnp.float32)
    bound2 = 1.0 / (feature_dim2 ** 0.5)
    w2 = jax.random.uniform(
        k2, (feature_dim2, out_dim2), jnp.float32, minval=-bound2, maxval=bound2
    )
    b2 = jax.random.uniform(
        k3, (out_dim2,), jnp.float32, minval=-bound2, maxval=bound2
    )

    y2 = bbox_regression_forward(
        x2, w2, b2, num_classes2, compute_dtype=jnp.bfloat16, out_dtype=jnp.float32
    )
    y2 = jax.block_until_ready(y2)
    ref2 = (x2 @ w2 + b2).reshape(batch2, num_classes2, 4)
    assert y2.shape == (batch2, num_classes2, 4)
    assert jnp.allclose(y2, ref2, atol=3e-2, rtol=3e-2)  # bf16 inputs: looser tol

    # ---- Test 3: forced K/N split (multi-K accumulator path, N grid axis) --
    batch3, feature_dim3, num_classes3 = 16, 256, 64
    out_dim3 = num_classes3 * 4
    k1, k2, k3, key = jax.random.split(key, 4)
    x3 = jax.random.normal(k1, (batch3, feature_dim3), dtype=jnp.float32)
    bound3 = 1.0 / (feature_dim3 ** 0.5)
    w3 = jax.random.uniform(
        k2, (feature_dim3, out_dim3), jnp.float32, minval=-bound3, maxval=bound3
    )
    b3 = jax.random.uniform(
        k3, (out_dim3,), jnp.float32, minval=-bound3, maxval=bound3
    )

    y3 = bbox_regression_forward(x3, w3, b3, num_classes3, tk=128, tn=128)
    y3 = jax.block_until_ready(y3)
    ref3 = (x3 @ w3 + b3).reshape(batch3, num_classes3, 4)
    assert y3.shape == (batch3, num_classes3, 4)
    assert jnp.allclose(y3, ref3, atol=1e-4, rtol=1e-4)

    print("KERNEL_OK")
</pallas_src>

<mosaic_0001>
module attributes {stable_mosaic.version = 11 : i64} {
  func.func @kernel(%arg0: i32, %arg1: i32, %arg2: i32, %arg3: memref<8x128xf32, #tpu.memory_space<vmem>>, %arg4: memref<128x128xf32, #tpu.memory_space<vmem>>, %arg5: memref<1x128xf32, #tpu.memory_space<vmem>>, %arg6: memref<8x128xf32, #tpu.memory_space<vmem>>) attributes {dimension_semantics = [#tpu.dimension_semantics<parallel>, #tpu.dimension_semantics<parallel>, #tpu.dimension_semantics<arbitrary>], iteration_bounds = array<i64: 1, 1, 1>, scalar_prefetch = 0 : i64, scratch_operands = 0 : i64, tpu.core_type = #tpu.core_type<tc>, window_params = [{transform_indices = @transform_0, window_bounds = array<i64: 8, 128>}, {transform_indices = @transform_1, window_bounds = array<i64: 128, 128>}, {transform_indices = @transform_2, window_bounds = array<i64: 1, 128>}, {transform_indices = @transform_3, window_bounds = array<i64: 8, 128>}]} {
    %c0 = arith.constant 0 : index
    %c0_0 = arith.constant 0 : index
    %0 = vector.load %arg3[%c0, %c0_0] : memref<8x128xf32, #tpu.memory_space<vmem>>, vector<8x128xf32>
    %c0_1 = arith.constant 0 : index
    %c0_2 = arith.constant 0 : index
    %1 = vector.load %arg4[%c0_1, %c0_2] : memref<128x128xf32, #tpu.memory_space<vmem>>, vector<128x128xf32>
    %cst = arith.constant dense<0.000000e+00> : vector<8x128xf32>
    %2 = tpu.matmul %0, %1, %cst {dimension_numbers = #tpu.dot_dimension_numbers<[1], [0], [0], [1], [0, 0, 1, 1], [], []>} : vector<8x128xf32>, vector<128x128xf32>, vector<8x128xf32> -> vector<8x128xf32>
    %c0_3 = arith.constant 0 : index
    %c0_4 = arith.constant 0 : index
    %3 = vector.load %arg5[%c0_3, %c0_4] : memref<1x128xf32, #tpu.memory_space<vmem>>, vector<1x128xf32>
    %4 = vector.broadcast %3 : vector<1x128xf32> to vector<8x128xf32>
    %5 = arith.addf %2, %4 : vector<8x128xf32>
    %c0_5 = arith.constant 0 : index
    %c0_6 = arith.constant 0 : index
    %6 = vector.load %arg6[%c0_5, %c0_6] : memref<8x128xf32, #tpu.memory_space<vmem>>, vector<8x128xf32>
    tpu.vector_store %arg6[%c0_5, %c0_6], %5 {strides = array<i32>} : memref<8x128xf32, #tpu.memory_space<vmem>>, vector<8x128xf32>,
    return
  }
  func.func @transform_0(%arg0: i32, %arg1: i32, %arg2: i32) -> (i32, i32) {
    %c0_i32 = arith.constant 0 : i32
    return %arg0, %arg2 : i32, i32
  }
  func.func @transform_1(%arg0: i32, %arg1: i32, %arg2: i32) -> (i32, i32) {
    %c0_i32 = arith.constant 0 : i32
    return %arg2, %arg1 : i32, i32
  }
  func.func @transform_2(%arg0: i32, %arg1: i32, %arg2: i32) -> (i32, i32) {
    %c0_i32 = arith.constant 0 : i32
    %c0_i32_0 = arith.constant 0 : i32
    return %c0_i32, %arg1 : i32, i32
  }
  func.func @transform_3(%arg0: i32, %arg1: i32, %arg2: i32) -> (i32, i32) {
    %c0_i32 = arith.constant 0 : i32
    return %arg0, %arg1 : i32, i32
  }
}

</mosaic_0001>

<bundles_post_ra>
// kernel: tpu_custom_call.1
= control target key start
LH: loop header
LB: loop body
LE: loop exit
PB: predicated region body
PF: predicated region fallthrough
CT: control target
= control target key end

     0   :  { %8 = vsyncpa [#allocation3], 0  ;;  %s383_s0 = inlined_call_operand.hbm [shape: f32[8,128], index: 0, kind: input, shape index: {}]   ;;  %s384_s1 = inlined_call_operand.hbm [shape: f32[128,128], index: 1, kind: input, shape index: {}]   ;;  %s385_s2 = inlined_call_operand.vmem [shape: f32[1,128], index: 2, kind: input, shape index: {}]   ;;  %s386_s3 = inlined_call_operand.hbm [shape: f32[8,128], index: 3, kind: output, shape index: {}]  }
   0x1   :  { %9 = vsyncpa [#allocation6], 0 }
   0x2   :  { %10 = vsyncpa [#allocation4], 0  ;;  %s309_s12 = smov [#allocation2]   ;;  %s310_s14 = smov [#allocation5]  }
   0x3   :  { %s17_s13 = sshll.u32 %s309_s12, 4  ;;  %s26_s15 = sshll.u32 %s310_s14, 4  ;;  %s18_s13 = int_to_ptr.vmem [resolvable:$true] %s17_s13  ;;  %s337_s15 = int_to_ptr.vmem [resolvable:$true] %s26_s15 }
   0x4   :  { %s237_s18 = scalar_lea.hbm %s383_s0, 128 }
   0x5   :  { %p238_p0 = scmp.ne.s32.totalorder %s383_s0, %s237_s18  ;;  %p241_p1 = scmp.lt.u32.totalorder %s237_s18, %s383_s0 }
   0x7   :  { %p243_p2 = pnand %p241_p1, %p238_p0 }
   0x9   :  { %246 = shalt.err (!%p243_p2)
}
   0xa   :  { %s247_s23 = scalar_lea.vmem %s18_s13, 128  ;;  %p252_p4 = scmp.lt.s32.totalorder %s18_s13, %s18_s13 }
   0xb   :  { %p248_p3 = scmp.ne.s32.totalorder %s18_s13, %s247_s23  ;;  %p253_p5 = scmp.lt.s32.totalorder %s247_s23, %s247_s23 }
   0xd   :  { %p254_p6 = por %p253_p5, %p252_p4 }
   0xf   :  { %p255_p7 = pnand %p254_p6, %p248_p3 }
  0x11   :  { %258 = shalt.err (!%p255_p7)
}
  0x12   :  { %20 = dma.hbm_to_vmem [thread:$0]  %s383_s0, 128, %s18_s13, [#allocation3]  }
  0x13   :  { %s259_s28 = scalar_lea.hbm %s384_s1, 2048 }
  0x14   :  { %p260_p8 = scmp.ne.s32.totalorder %s384_s1, %s259_s28  ;;  %p263_p9 = scmp.lt.u32.totalorder %s259_s28, %s384_s1 }
  0x16   :  { %p265_p10 = pnand %p263_p9, %p260_p8 }
  0x18   :  { %268 = shalt.err (!%p265_p10)
}
  0x19   :  { %s269_s6 = scalar_lea.vmem %s337_s15, 2048  ;;  %p274_p12 = scmp.lt.s32.totalorder %s337_s15, %s337_s15 }
  0x1a   :  { %p270_p11 = scmp.ne.s32.totalorder %s337_s15, %s269_s6  ;;  %p275_p13 = scmp.lt.s32.totalorder %s269_s6, %s269_s6 }
  0x1c   :  { %p276_p0 = por %p275_p13, %p274_p12 }
  0x1e   :  { %p277_p1 = pnand %p276_p0, %p270_p11 }
  0x20   :  { %280 = shalt.err (!%p277_p1)
}
  0x21   :  { %s311_s0 = smov 128   ;;  %s312_s7 = smov 8  }
  0x22   :  { %32 = dma.hbm_to_vmem [thread:$0]  %s384_s1, 2048, %s337_s15, [#allocation6], %s311_s0, %s311_s0, %s312_s7  }
  0x23   :  { %303 = dma.done.wait [#allocation3], 128  }
  0x24   :  { %304 = vsyncadd [#allocation3], 4294967168 }
  0x25   :  { %305 = dma.done.wait [#allocation6], 2048  }
  0x26   :  { %306 = vsyncadd [#allocation6], 4294965248  ;;  %v313_v0 = vmov 0.0|0.0   ;;  %vm314_vm0 = vmmov 0   ;;  %v315_v1 = vmov 0.0   ;;  %v42_v2 = vld [vmem:[#allocation5] sm:$0xff] }
  0x27   :  { %205 = vmatprep.subr.bf16.mxu0 %v313_v0  ;;  %202 = vmatprep.mubr.msk.f32.mxu0 %vm314_vm0, %v315_v1  ;;  %v43_v3 = vld [vmem:[#allocation5 + $0x8] sm:$0xff]  ;;  %v44_v4 = vld [vmem:[#allocation5 + $0x10] sm:$0xff]  ;;  %v45_v6 = vld [vmem:[#allocation5 + $0x18] sm:$0xff]  ;;  %s316_s11 = smov [#allocation7]  }
  0x28   :  { %v206_v5 = vpack.c.bf16 %v43_v3, %v42_v2  ;;  %v209_v7 = vpack.c.bf16 %v45_v6, %v44_v4  ;;  %v46_v8 = vld [vmem:[#allocation5 + $0x20] sm:$0xff]  ;;  %v47_v9 = vld [vmem:[#allocation5 + $0x28] sm:$0xff]  ;;  %v48_v11 = vld [vmem:[#allocation5 + $0x30] sm:$0xff]  ;;  %s142_s12 = sshll.u32 %s316_s11, 4  ;;  %s143_s12 = int_to_ptr.vmem [resolvable:$true] %s142_s12 }
  0x29   :  { %v212_v10 = vpack.c.bf16 %v47_v9, %v46_v8  ;;  %v49_v12 = vld [vmem:[#allocation5 + $0x38] sm:$0xff]  ;;  %v50_v14 = vld [vmem:[#allocation5 + $0x40] sm:$0xff]  ;;  %v51_v15 = vld [vmem:[#allocation5 + $0x48] sm:$0xff]  ;;  %s281_s13 = scalar_lea.vmem %s143_s12, 128  ;;  %p286_p3 = scmp.lt.s32.totalorder %s143_s12, %s143_s12 }
  0x2a   :  { %207 = vmatpush3.bf16.msra.mxu0 %v206_v5  ;;  %v215_v13 = vpack.c.bf16 %v49_v12, %v48_v11  ;;  %v218_v16 = vpack.c.bf16 %v51_v15, %v50_v14  ;;  %v52_v17 = vld [vmem:[#allocation5 + $0x50] sm:$0xff]  ;;  %v53_v18 = vld [vmem:[#allocation5 + $0x58] sm:$0xff]  ;;  %v54_v20 = vld [vmem:[#allocation5 + $0x60] sm:$0xff]  ;;  %p282_p2 = scmp.ne.s32.totalorder %s143_s12, %s281_s13  ;;  %p287_p4 = scmp.lt.s32.totalorder %s281_s13, %s281_s13 }
  0x2b   :  { %208 = vmatprep.subr.bf16.mxu0 %v313_v0  ;;  %v221_v19 = vpack.c.bf16 %v53_v18, %v52_v17  ;;  %v55_v21 = vld [vmem:[#allocation5 + $0x68] sm:$0xff]  ;;  %v56_v23 = vld [vmem:[#allocation5 + $0x70] sm:$0xff]  ;;  %v57_v24 = vld [vmem:[#allocation5 + $0x78] sm:$0xff] }
  0x2c   :  { %v224_v22 = vpack.c.bf16 %v55_v21, %v54_v20  ;;  %v227_v25 = vpack.c.bf16 %v57_v24, %v56_v23  ;;  %v41_v26 = vld [vmem:[#allocation2] sm:$0xff]  ;;  %p288_p5 = por %p287_p4, %p286_p3 }
  0x2d   :  { %v152_v27 = vld [vmem:[%s385_s2] ss:$0 sm:$0xff] }
  0x2e   :  { %210 = vmatpush3.bf16.msra.mxu0 %v209_v7  ;;  %p289_p6 = pnand %p288_p5, %p282_p2 }
  0x2f   :  { %211 = vmatprep.subr.bf16.mxu0 %v313_v0 }
  0x32   :  { %213 = vmatpush3.bf16.msra.mxu0 %v212_v10 }
  0x33   :  { %214 = vmatprep.subr.bf16.mxu0 %v313_v0 }
  0x36   :  { %216 = vmatpush3.bf16.msra.mxu0 %v215_v13 }
  0x37   :  { %217 = vmatprep.subr.bf16.mxu0 %v313_v0 }
  0x3a   :  { %219 = vmatpush3.bf16.msra.mxu0 %v218_v16 }
  0x3b   :  { %220 = vmatprep.subr.bf16.mxu0 %v313_v0 }
  0x3e   :  { %222 = vmatpush3.bf16.msra.mxu0 %v221_v19 }
  0x3f   :  { %223 = vmatprep.subr.bf16.mxu0 %v313_v0 }
  0x42   :  { %225 = vmatpush3.bf16.msra.mxu0 %v224_v22 }
  0x43   :  { %226 = vmatprep.subr.bf16.mxu0 %v313_v0 }
  0x46   :  { %228 = vmatpush3.bf16.msra.mxu0 %v227_v25 }
  0x49   :  { %203 = vmatmul.mubr.f32.vlgmr.msra.gmra.mrb[0].mxu0 %v41_v26 }
 0x11c   :  { %v131_v28 = vpop.f32.mrb[0].mxu0 }
 0x11d   :  { %v132_v29 = vadd.f32 %v152_v27, %v131_v28  ;;  %v204_v30 = vpop.f32.mrb[1].mxu0 }
 0x11f   :  { %135 = vst [vmem:[#allocation7] sm:$0xff] %v132_v29 }
 0x120   :  { %292 = shalt.err (!%p289_p6)
}
 0x121   :  { %s293_s16 = scalar_lea.hbm %s386_s3, 128 }
 0x122   :  { %p294_p7 = scmp.ne.s32.totalorder %s386_s3, %s293_s16  ;;  %p297_p8 = scmp.lt.u32.totalorder %s293_s16, %s386_s3 }
 0x124   :  { %p299_p9 = pnand %p297_p8, %p294_p7 }
 0x126   :  { %302 = shalt.err (!%p299_p9)
}
 0x127   :  { %145 = dma.vmem_to_hbm [thread:$0]  %s143_s12, 128, %s386_s3, [#allocation4]  }
 0x128   :  { %307 = dma.done.wait [#allocation4], 128  }
 0x129   :  { %308 = vsyncadd [#allocation4], 4294967168 }
 0x12a   :  { %149 = vsyncpa [#allocation3], 1 }
 0x12b   :  { %150 = vsyncpa [#allocation6], 1 }
 0x12c   :  { %151 = vsyncpa [#allocation4], 1 }

</bundles_post_ra>
